<compile_context>
chip_gen: v7x
topology: tpu7x:2x2x1
jax: 0.10.0
libtpu: 0.0.40
codegen_flags: <defaults>
</compile_context>

<pallas_src>
import functools

import jax
import jax.numpy as jnp
from jax.experimental import pallas as pl
from jax.experimental.pallas import tpu as pltpu


_LANE = 128  # TPU lane width (last dim)


def _round_up(x, m):
    return ((x + m - 1) // m) * m


def _vmem_limit_bytes():
    """Generation-aware VMEM budget (v5e/v6e: 128 MiB physical, v7x: 64 MiB)."""
    default = 64 * 1024 * 1024
    try:
        cap = int(getattr(pltpu.get_tpu_info(), "vmem_capacity_bytes", default))
    except Exception:  # conservative fallback if the query is unavailable
        cap = default
    # Leave ~25% headroom for compiler-internal scratch, cap at 100 MiB.
    return int(min(cap * 3 // 4, 100 * 1024 * 1024))


def prepare_clip_classifier_params(w_enc, w1, b1, w2, b2, num_classes=2):
    """One-time weight cast + pad, hoisted OUT of the per-forward hot path.

    Weights are stored [in, out] (transposed vs. PyTorch [out, in]) so the
    kernel computes y = x @ W + b directly; biases are [1, out] f32.  Output
    dims are zero-padded to 128 lanes (zero pad on contraction dims is exact).
    The pixel (P) dim of the encoder weight is intentionally NOT padded so the
    pixel array can be fed to the kernel completely untouched.
    """
    P, F = w_enc.shape
    E = w1.shape[1]
    F_pad = _round_up(F, _LANE)
    E_pad = _round_up(E, _LANE)
    C_pad = _round_up(num_classes, _LANE)

    def pad2(a, rows, cols):
        return jnp.pad(a, ((0, rows - a.shape[0]), (0, cols - a.shape[1])))

    we = pad2(w_enc.astype(jnp.bfloat16), P, F_pad)
    w1p = pad2(w1.astype(jnp.bfloat16), F_pad, E_pad)
    b1p = pad2(b1.astype(jnp.float32), 1, E_pad)
    w2p = pad2(w2.astype(jnp.bfloat16), E_pad, C_pad)
    b2p = pad2(b2.astype(jnp.float32), 1, C_pad)
    return (we, w1p, b1p, w2p, b2p)


def _clip_fwd_kernel(x_ref, we_ref, w1_ref, b1_ref, w2_ref, b2_ref, o_ref,
                     acc_ref):
    """Fused forward: logits = relu((x @ We) @ W1 + b1) @ W2 + b2.

    Grid = (batch tiles, pixel/K tiles).  The encoder matmul accumulates into
    an f32 VMEM scratch over the K axis; the head (fc + relu + classifier)
    runs once per batch tile on the last K step.
    """
    k = pl.program_id(1)

    @pl.when(k == 0)
    def _():
        acc_ref[...] = jnp.zeros_like(acc_ref)

    # Cast the pixel tile to bf16 on the VMEM tile (no wrapper-side cast pass).
    x = x_ref[...].astype(jnp.bfloat16)                            # [TB, TK]
    # TODO(synk): real CLIP image encoder (frozen ViT encode_image) has no
    # Pallas equivalent; this frozen linear projection is a stand-in.
    acc_ref[...] += jnp.dot(x, we_ref[...],
                            preferred_element_type=jnp.float32)    # [TB, F]

    @pl.when(k == pl.num_programs(1) - 1)
    def _():
        feat = acc_ref[...].astype(jnp.bfloat16)                   # bf16 MXU path
        h = jnp.dot(feat, w1_ref[...],
                    preferred_element_type=jnp.float32) + b1_ref[...]
        h = jnp.maximum(h, 0.0).astype(jnp.bfloat16)               # ReLU
        logits = jnp.dot(h, w2_ref[...],
                         preferred_element_type=jnp.float32) + b2_ref[...]
        o_ref[...] = logits.astype(o_ref.dtype)                    # bf16 writeback


def _select_tiles(B, P, F_pad, E_pad, C_pad, vmem_budget):
    """Pick (TB, B_pad, TK) from the VMEM budget.

    TB: prefers >=2 grid steps when B allows (so v7x's 2 TensorCores both get
    work), minimal batch-padding waste, then the largest tile that fits.
    TK: largest multiple of 128 dividing P that fits (so the pixel array needs
    no lane padding); if P is not a 128-multiple, a single full-dim block.
    """
    budget = int(vmem_budget * 0.9)
    # Constant-index weight/bias blocks (double-buffered by default pipelining).
    const = 2 * (F_pad * E_pad * 2 + E_pad * 4 + E_pad * C_pad * 2 + C_pad * 4)

    def fits(tb, tk):
        need = (const
                + 2 * tb * tk * 4        # f32 pixel tiles (double-buffered)
                + 2 * tk * F_pad * 2     # bf16 encoder-weight tiles
                + 2 * tb * C_pad * 2     # bf16 logits tiles
                + tb * F_pad * 4)        # f32 accumulator scratch
        return need <= budget

    tk_min = _LANE if P % _LANE == 0 else P

    if B <= 16:
        tb, b_pad = B, B                 # single full-dim block: no batch pad
    else:
        best = None
        for t in (1024, 512, 256, 128, 64, 32, 16):
            if not fits(t, tk_min):
                continue
            nb = -(-B // t)
            key = (0 if nb >= 2 else 1,  # prefer >=2 steps (megacore sharding)
                   nb * t - B,           # then minimal batch-padding waste
                   -t)                   # then largest tile (amortize overhead)
            if best is None or key < best[0]:
                best = (key, t)
        tb = best[1] if best is not None else 16
        b_pad = _round_up(B, tb)

    if P % _LANE == 0:
        tk = _LANE
        for cand in range(P, 0, -_LANE):
            if P % cand == 0 and fits(tb, cand):
                tk = cand
                break
    else:
        tk = P                           # full-dim block (no lane padding)
    return tb, b_pad, tk


def clip_classifier_forward(images_flat, params, *, num_classes=2):
    """Pallas forward for the ClipClassifier head. Returns [B, num_classes] f32."""
    we, w1p, b1p, w2p, b2p = params
    B, P = images_flat.shape
    assert we.shape[0] == P, "encoder weight pixel dim must match input"
    F_pad, E_pad, C_pad = we.shape[1], w1p.shape[1], w2p.shape[1]

    vmem_budget = _vmem_limit_bytes()
    TB, B_pad, TK = _select_tiles(B, P, F_pad, E_pad, C_pad, vmem_budget)

    x = images_flat
    if B_pad != B:
        # Tail-only batch padding (TB chosen to minimize this waste); pixels
        # keep the caller's dtype -- bf16 cast happens on the VMEM tile.
        x = jnp.pad(x, ((0, B_pad - B), (0, 0)))

    grid = (B_pad // TB, P // TK)

    out = pl.pallas_call(
        _clip_fwd_kernel,
        out_shape=jax.ShapeDtypeStruct((B_pad, C_pad), jnp.bfloat16),
        grid_spec=pltpu.PrefetchScalarGridSpec(
            num_scalar_prefetch=0,
            grid=grid,
            in_specs=[
                pl.BlockSpec((TB, TK), lambda i, k: (i, k)),        # pixels
                pl.BlockSpec((TK, F_pad), lambda i, k: (k, 0)),     # frozen encoder
                pl.BlockSpec((F_pad, E_pad), lambda i, k: (0, 0)),  # fc weight [in,out]
                pl.BlockSpec((1, E_pad), lambda i, k: (0, 0)),      # fc bias
                pl.BlockSpec((E_pad, C_pad), lambda i, k: (0, 0)),  # classifier weight
                pl.BlockSpec((1, C_pad), lambda i, k: (0, 0)),      # classifier bias
            ],
            out_specs=pl.BlockSpec((TB, C_pad), lambda i, k: (i, 0)),
            scratch_shapes=[pltpu.VMEM((TB, F_pad), jnp.float32)],
        ),
        compiler_params=pltpu.CompilerParams(
            # batch tiles independent -> shard across v7x's 2 TensorCores;
            # K (pixel) axis is the reduction -> arbitrary.
            dimension_semantics=("parallel", "arbitrary"),
            vmem_limit_bytes=vmem_budget,
        ),
    )(x, we, w1p, b1p, w2p, b2p)
    return out[:B, :num_classes].astype(jnp.float32)


def _uniform_like_torch_linear(key, fan_in, shape):
    # PyTorch nn.Linear default init: U(-1/sqrt(fan_in), 1/sqrt(fan_in))
    bound = 1.0 / jnp.sqrt(jnp.float32(fan_in))
    return jax.random.uniform(key, shape, jnp.float32, -bound, bound)


if __name__ == "__main__":
    key = jax.random.PRNGKey(0)
    k_img, k_enc, k_w1, k_b1, k_w2, k_b2 = jax.random.split(key, 6)

    # Small shapes consistent with the module's forward:
    B, C, H, W = 2, 3, 16, 16          # images, NCHW (PyTorch convention)
    clip_output_dim = 64               # stand-in for clip_model.visual.output_dim
    embed_dim = 256                    # nn.Linear(clip_output_dim, embed_dim)
    num_classes = 2                    # nn.Linear(embed_dim, 2)

    images = jax.random.normal(k_img, (B, C, H, W), jnp.float32)
    images_flat = images.reshape(B, C * H * W)                  # [B, 768]

    # Frozen encoder stand-in (deterministic linear projection of pixels).
    enc_w = jax.random.normal(k_enc, (C * H * W, clip_output_dim),
                              jnp.float32) * 0.02

    # Trainable head parameters (deterministic, PyTorch-Linear-style init).
    w1 = _uniform_like_torch_linear(k_w1, clip_output_dim,
                                    (clip_output_dim, embed_dim))
    b1 = _uniform_like_torch_linear(k_b1, clip_output_dim, (1, embed_dim))
    w2 = _uniform_like_torch_linear(k_w2, embed_dim, (embed_dim, num_classes))
    b2 = _uniform_like_torch_linear(k_b2, embed_dim, (1, num_classes))

    # One-time weight preparation, hoisted out of the per-call hot path.
    params = prepare_clip_classifier_params(enc_w, w1, b1, w2, b2, num_classes)
    params = jax.tree_util.tree_map(jax.block_until_ready, params)

    forward = jax.jit(functools.partial(clip_classifier_forward,
                                        num_classes=num_classes))
    logits = jax.block_until_ready(forward(images_flat, params))

    # Pure-JAX reference on the same bf16-operand / f32-accumulate path.
    xb = images_flat.astype(jnp.bfloat16)
    feat = jnp.dot(xb, enc_w.astype(jnp.bfloat16),
                   preferred_element_type=jnp.float32).astype(jnp.bfloat16)
    h = jnp.maximum(jnp.dot(feat, w1.astype(jnp.bfloat16),
                            preferred_element_type=jnp.float32) + b1, 0.0)
    h = h.astype(jnp.bfloat16)
    ref = jnp.dot(h, w2.astype(jnp.bfloat16),
                  preferred_element_type=jnp.float32) + b2
    ref = ref.astype(jnp.bfloat16).astype(jnp.float32)   # match bf16 writeback

    assert logits.shape == (B, num_classes)
    assert jnp.allclose(logits, ref, atol=2e-2, rtol=2e-2), (logits, ref)

    print("KERNEL_OK")
</pallas_src>

<mosaic_0001>
module attributes {stable_mosaic.version = 11 : i64} {
  func.func @_clip_fwd_kernel(%arg0: i32, %arg1: i32, %arg2: memref<2x768xf32, #tpu.memory_space<vmem>>, %arg3: memref<768x128xbf16, #tpu.memory_space<vmem>>, %arg4: memref<128x256xbf16, #tpu.memory_space<vmem>>, %arg5: memref<1x256xf32, #tpu.memory_space<vmem>>, %arg6: memref<256x128xbf16, #tpu.memory_space<vmem>>, %arg7: memref<1x128xf32, #tpu.memory_space<vmem>>, %arg8: memref<2x128xbf16, #tpu.memory_space<vmem>>, %arg9: memref<2x128xf32, #tpu.memory_space<vmem>>) attributes {dimension_semantics = [#tpu.dimension_semantics<parallel>, #tpu.dimension_semantics<arbitrary>], iteration_bounds = array<i64: 1, 1>, scalar_prefetch = 0 : i64, scratch_operands = 1 : i64, tpu.core_type = #tpu.core_type<tc>, window_params = [{transform_indices = @transform_0, window_bounds = array<i64: 2, 768>}, {transform_indices = @transform_1, window_bounds = array<i64: 768, 128>}, {pipeline_mode = #tpu.pipeline_mode<synchronous>, transform_indices = @transform_2, window_bounds = array<i64: 128, 256>}, {pipeline_mode = #tpu.pipeline_mode<synchronous>, transform_indices = @transform_3, window_bounds = array<i64: 1, 256>}, {pipeline_mode = #tpu.pipeline_mode<synchronous>, transform_indices = @transform_4, window_bounds = array<i64: 256, 128>}, {pipeline_mode = #tpu.pipeline_mode<synchronous>, transform_indices = @transform_5, window_bounds = array<i64: 1, 128>}, {transform_indices = @transform_6, window_bounds = array<i64: 2, 128>}]} {
    %c0_i32 = arith.constant 0 : i32
    %0 = arith.cmpi eq, %arg1, %c0_i32 : i32
    %1 = arith.extui %0 : i1 to i32
    %c0_i32_0 = arith.constant 0 : i32
    %2 = arith.cmpi ne, %1, %c0_i32_0 : i32
    scf.if %2 {
      %cst_10 = arith.constant 0.000000e+00 : f32
      %13 = vector.broadcast %cst_10 : f32 to vector<2x128xf32>
      %c0_11 = arith.constant 0 : index
      %c0_12 = arith.constant 0 : index
      %14 = vector.load %arg9[%c0_11, %c0_12] : memref<2x128xf32, #tpu.memory_space<vmem>>, vector<2x128xf32>
      tpu.vector_store %arg9[%c0_11, %c0_12], %13 {strides = array<i32>} : memref<2x128xf32, #tpu.memory_space<vmem>>, vector<2x128xf32>,
    } else {
    }
    %c0 = arith.constant 0 : index
    %c0_1 = arith.constant 0 : index
    %3 = vector.load %arg2[%c0, %c0_1] : memref<2x768xf32, #tpu.memory_space<vmem>>, vector<2x768xf32>
    %4 = arith.truncf %3 : vector<2x768xf32> to vector<2x768xbf16>
    %c0_2 = arith.constant 0 : index
    %c0_3 = arith.constant 0 : index
    %5 = vector.load %arg9[%c0_2, %c0_3] : memref<2x128xf32, #tpu.memory_space<vmem>>, vector<2x128xf32>
    %c0_4 = arith.constant 0 : index
    %c0_5 = arith.constant 0 : index
    %6 = vector.load %arg3[%c0_4, %c0_5] : memref<768x128xbf16, #tpu.memory_space<vmem>>, vector<768x128xbf16>
    %cst = arith.constant dense<0.000000e+00> : vector<2x128xf32>
    %7 = tpu.matmul %4, %6, %cst {dimension_numbers = #tpu.dot_dimension_numbers<[1], [0], [0], [1], [0, 0, 1, 1], [], []>} : vector<2x768xbf16>, vector<768x128xbf16>, vector<2x128xf32> -> vector<2x128xf32>
    %8 = arith.addf %5, %7 : vector<2x128xf32>
    %c0_6 = arith.constant 0 : index
    %c0_7 = arith.constant 0 : index
    %9 = vector.load %arg9[%c0_6, %c0_7] : memref<2x128xf32, #tpu.memory_space<vmem>>, vector<2x128xf32>
    tpu.vector_store %arg9[%c0_6, %c0_7], %8 {strides = array<i32>} : memref<2x128xf32, #tpu.memory_space<vmem>>, vector<2x128xf32>,
    %c0_i32_8 = arith.constant 0 : i32
    %10 = arith.cmpi eq, %arg1, %c0_i32_8 : i32
    %11 = arith.extui %10 : i1 to i32
    %c0_i32_9 = arith.constant 0 : i32
    %12 = arith.cmpi ne, %11, %c0_i32_9 : i32
    scf.if %12 {
      %c0_10 = arith.constant 0 : index
      %c0_11 = arith.constant 0 : index
      %13 = vector.load %arg9[%c0_10, %c0_11] : memref<2x128xf32, #tpu.memory_space<vmem>>, vector<2x128xf32>
      %14 = arith.truncf %13 : vector<2x128xf32> to vector<2x128xbf16>
      %c0_12 = arith.constant 0 : index
      %c0_13 = arith.constant 0 : index
      %15 = vector.load %arg4[%c0_12, %c0_13] : memref<128x256xbf16, #tpu.memory_space<vmem>>, vector<128x256xbf16>
      %cst_14 = arith.constant dense<0.000000e+00> : vector<2x256xf32>
      %16 = tpu.matmul %14, %15, %cst_14 {dimension_numbers = #tpu.dot_dimension_numbers<[1], [0], [0], [1], [0, 0, 1, 1], [], []>} : vector<2x128xbf16>, vector<128x256xbf16>, vector<2x256xf32> -> vector<2x256xf32>
      %c0_15 = arith.constant 0 : index
      %c0_16 = arith.constant 0 : index
      %17 = vector.load %arg5[%c0_15, %c0_16] : memref<1x256xf32, #tpu.memory_space<vmem>>, vector<1x256xf32>
      %18 = vector.broadcast %17 : vector<1x256xf32> to vector<2x256xf32>
      %19 = arith.addf %16, %18 : vector<2x256xf32>
      %cst_17 = arith.constant 0.000000e+00 : f32
      %20 = vector.broadcast %cst_17 : f32 to vector<2x256xf32>
      %21 = arith.maximumf %19, %20 : vector<2x256xf32>
      %22 = arith.truncf %21 : vector<2x256xf32> to vector<2x256xbf16>
      %c0_18 = arith.constant 0 : index
      %c0_19 = arith.constant 0 : index
      %23 = vector.load %arg6[%c0_18, %c0_19] : memref<256x128xbf16, #tpu.memory_space<vmem>>, vector<256x128xbf16>
      %cst_20 = arith.constant dense<0.000000e+00> : vector<2x128xf32>
      %24 = tpu.matmul %22, %23, %cst_20 {dimension_numbers = #tpu.dot_dimension_numbers<[1], [0], [0], [1], [0, 0, 1, 1], [], []>} : vector<2x256xbf16>, vector<256x128xbf16>, vector<2x128xf32> -> vector<2x128xf32>
      %c0_21 = arith.constant 0 : index
      %c0_22 = arith.constant 0 : index
      %25 = vector.load %arg7[%c0_21, %c0_22] : memref<1x128xf32, #tpu.memory_space<vmem>>, vector<1x128xf32>
      %26 = vector.broadcast %25 : vector<1x128xf32> to vector<2x128xf32>
      %27 = arith.addf %24, %26 : vector<2x128xf32>
      %28 = arith.truncf %27 : vector<2x128xf32> to vector<2x128xbf16>
      %c0_23 = arith.constant 0 : index
      %c0_24 = arith.constant 0 : index
      %29 = vector.load %arg8[%c0_23, %c0_24] : memref<2x128xbf16, #tpu.memory_space<vmem>>, vector<2x128xbf16>
      tpu.vector_store %arg8[%c0_23, %c0_24], %28 {strides = array<i32>} : memref<2x128xbf16, #tpu.memory_space<vmem>>, vector<2x128xbf16>,
    } else {
    }
    return
  }
  func.func @transform_0(%arg0: i32, %arg1: i32) -> (i32, i32) {
    %c0_i32 = arith.constant 0 : i32
    return %arg0, %arg1 : i32, i32
  }
  func.func @transform_1(%arg0: i32, %arg1: i32) -> (i32, i32) {
    %c0_i32 = arith.constant 0 : i32
    %c0_i32_0 = arith.constant 0 : i32
    return %arg1, %c0_i32 : i32, i32
  }
  func.func @transform_2(%arg0: i32, %arg1: i32) -> (i32, i32) {
    %c0_i32 = arith.constant 0 : i32
    %c0_i32_0 = arith.constant 0 : i32
    %c0_i32_1 = arith.constant 0 : i32
    return %c0_i32, %c0_i32_0 : i32, i32
  }
  func.func @transform_3(%arg0: i32, %arg1: i32) -> (i32, i32) {
    %c0_i32 = arith.constant 0 : i32
    %c0_i32_0 = arith.constant 0 : i32
    %c0_i32_1 = arith.constant 0 : i32
    return %c0_i32, %c0_i32_0 : i32, i32
  }
  func.func @transform_4(%arg0: i32, %arg1: i32) -> (i32, i32) {
    %c0_i32 = arith.constant 0 : i32
    %c0_i32_0 = arith.constant 0 : i32
    %c0_i32_1 = arith.constant 0 : i32
    return %c0_i32, %c0_i32_0 : i32, i32
  }
  func.func @transform_5(%arg0: i32, %arg1: i32) -> (i32, i32) {
    %c0_i32 = arith.constant 0 : i32
    %c0_i32_0 = arith.constant 0 : i32
    %c0_i32_1 = arith.constant 0 : i32
    return %c0_i32, %c0_i32_0 : i32, i32
  }
  func.func @transform_6(%arg0: i32, %arg1: i32) -> (i32, i32) {
    %c0_i32 = arith.constant 0 : i32
    %c0_i32_0 = arith.constant 0 : i32
    return %arg0, %c0_i32 : i32, i32
  }
}

</mosaic_0001>

<bundles_post_ra>
// kernel: clip_classifier_forward.1
= control target key start
LH: loop header
LB: loop body
LE: loop exit
PB: predicated region body
PF: predicated region fallthrough
CT: control target
= control target key end

     0   :  { %11 = vsyncpa [#allocation4], 0  ;;  %s1450_s0 = inlined_call_operand.hbm [shape: f32[2,768], index: 0, kind: input, shape index: {}]   ;;  %s1451_s1 = inlined_call_operand.hbm [shape: bf16[768,128], index: 1, kind: input, shape index: {}]   ;;  %s1452_s2 = inlined_call_operand.hbm [shape: bf16[128,256], index: 2, kind: input, shape index: {}]   ;;  %s1453_s3 = inlined_call_operand.vmem [shape: f32[1,256], index: 3, kind: input, shape index: {}]   ;;  %s1454_s4 = inlined_call_operand.hbm [shape: bf16[256,128], index: 4, kind: input, shape index: {}]   ;;  %s1455_s5 = inlined_call_operand.vmem [shape: f32[1,128], index: 5, kind: input, shape index: {}]   ;;  %s1456_s6 = inlined_call_operand.vmem [shape: bf16[2,128], index: 6, kind: output, shape index: {}]  }
   0x1   :  { %12 = vsyncpa [#allocation6], 0 }
   0x2   :  { %13 = vsyncpa [#allocation9], 0  ;;  %s1336_s21 = smov [#allocation5]   ;;  %s1242_s25 = scalar_lea.hbm %s1451_s1, 6144 }
   0x3   :  { %s29_s22 = sshll.u32 %s1336_s21, 4  ;;  %p1243_p0 = scmp.ne.s32.totalorder %s1451_s1, %s1242_s25  ;;  %s30_s22 = int_to_ptr.vmem [resolvable:$true] %s29_s22 }
   0x4   :  { %p1246_p1 = scmp.lt.u32.totalorder %s1242_s25, %s1451_s1 }
   0x6   :  { %p1248_p2 = pnand %p1246_p1, %p1243_p0 }
   0x8   :  { %1251 = shalt.err (!%p1248_p2)
}
   0x9   :  { %s1252_s30 = scalar_lea.vmem %s30_s22, 6144  ;;  %p1257_p4 = scmp.lt.s32.totalorder %s30_s22, %s30_s22 }
   0xa   :  { %p1253_p3 = scmp.ne.s32.totalorder %s30_s22, %s1252_s30  ;;  %p1258_p5 = scmp.lt.s32.totalorder %s1252_s30, %s1252_s30 }
   0xc   :  { %p1259_p6 = por %p1258_p5, %p1257_p4 }
   0xe   :  { %p1260_p7 = pnand %p1259_p6, %p1253_p3 }
  0x10   :  { %1263 = shalt.err (!%p1260_p7)
}
  0x11   :  { %s1337_s7 = smov 64   ;;  %s1338_s8 = smov 4  }
  0x12   :  { %35 = dma.hbm_to_vmem [thread:$0]  %s1451_s1, 6144, %s30_s22, [#allocation6], %s1337_s7, %s1337_s7, %s1338_s8  }
  0x13   :  { %s1339_s11 = smov [#allocation3]   ;;  %s1340_s13 = smov [#allocation7]  }
  0x14   :  { %s20_s12 = sshll.u32 %s1339_s11, 4  ;;  %s41_s14 = sshll.u32 %s1340_s13, 4  ;;  %s21_s12 = int_to_ptr.vmem [resolvable:$true] %s20_s12  ;;  %s42_s14 = int_to_ptr.vmem [resolvable:$true] %s41_s14 }
  0x15   :  { %s1264_s17 = scalar_lea.hbm %s1450_s0, 192 }
  0x16   :  { %p1265_p8 = scmp.ne.s32.totalorder %s1450_s0, %s1264_s17  ;;  %p1268_p9 = scmp.lt.u32.totalorder %s1264_s17, %s1450_s0 }
  0x18   :  { %p1270_p10 = pnand %p1268_p9, %p1265_p8 }
  0x1a   :  { %1273 = shalt.err (!%p1270_p10)
}
  0x1b   :  { %s1274_s1 = scalar_lea.vmem %s21_s12, 192  ;;  %p1279_p12 = scmp.lt.s32.totalorder %s21_s12, %s21_s12 }
  0x1c   :  { %p1275_p11 = scmp.ne.s32.totalorder %s21_s12, %s1274_s1  ;;  %p1280_p13 = scmp.lt.s32.totalorder %s1274_s1, %s1274_s1 }
  0x1e   :  { %p1281_p0 = por %p1280_p13, %p1279_p12 }
  0x20   :  { %p1282_p1 = pnand %p1281_p0, %p1275_p11 }
  0x22   :  { %1285 = shalt.err (!%p1282_p1)
}
  0x23   :  { %23 = dma.hbm_to_vmem [thread:$0]  %s1450_s0, 192, %s21_s12, [#allocation4]  }
  0x24   :  { %s1286_s26 = scalar_lea.hbm %s1452_s2, 2048 }
  0x25   :  { %p1287_p2 = scmp.ne.s32.totalorder %s1452_s2, %s1286_s26  ;;  %p1290_p3 = scmp.lt.u32.totalorder %s1286_s26, %s1452_s2 }
  0x27   :  { %p1292_p4 = pnand %p1290_p3, %p1287_p2 }
  0x29   :  { %1295 = shalt.err (!%p1292_p4)
}
  0x2a   :  { %s1296_s9 = scalar_lea.vmem %s42_s14, 2048  ;;  %p1301_p6 = scmp.lt.s32.totalorder %s42_s14, %s42_s14 }
  0x2b   :  { %p1297_p5 = scmp.ne.s32.totalorder %s42_s14, %s1296_s9  ;;  %p1302_p7 = scmp.lt.s32.totalorder %s1296_s9, %s1296_s9 }
  0x2d   :  { %p1303_p8 = por %p1302_p7, %p1301_p6 }
  0x2f   :  { %p1304_p9 = pnand %p1303_p8, %p1297_p5 }
  0x31   :  { %1307 = shalt.err (!%p1304_p9)
}
  0x32   :  { %s1341_s0 = smov 128   ;;  %s1342_s10 = smov 8  }
  0x33   :  { %47 = dma.hbm_to_vmem [thread:$0]  %s1452_s2, 2048, %s42_s14, [#allocation6], %s1341_s0, %s1341_s0, %s1342_s10  }
  0x34   :  { %s1343_s13 = smov [#allocation8]   ;;  %s1308_s18 = scalar_lea.hbm %s1454_s4, 2048 }
  0x35   :  { %s55_s15 = sshll.u32 %s1343_s13, 4  ;;  %p1309_p10 = scmp.ne.s32.totalorder %s1454_s4, %s1308_s18  ;;  %s56_s15 = int_to_ptr.vmem [resolvable:$true] %s55_s15 }
  0x36   :  { %p1312_p11 = scmp.lt.u32.totalorder %s1308_s18, %s1454_s4 }
  0x38   :  { %p1314_p12 = pnand %p1312_p11, %p1309_p10 }
  0x3a   :  { %1317 = shalt.err (!%p1314_p12)
}
  0x3b   :  { %s1318_s22 = scalar_lea.vmem %s56_s15, 2048  ;;  %p1323_p0 = scmp.lt.s32.totalorder %s56_s15, %s56_s15 }
  0x3c   :  { %p1319_p13 = scmp.ne.s32.totalorder %s56_s15, %s1318_s22  ;;  %p1324_p1 = scmp.lt.s32.totalorder %s1318_s22, %s1318_s22 }
  0x3e   :  { %p1325_p2 = por %p1324_p1, %p1323_p0 }
  0x40   :  { %p1326_p3 = pnand %p1325_p2, %p1319_p13 }
  0x42   :  { %1329 = shalt.err (!%p1326_p3)
}
  0x43   :  { %61 = dma.hbm_to_vmem [thread:$0]  %s1454_s4, 2048, %s56_s15, [#allocation9], %s1337_s7, %s1337_s7, %s1338_s8  }
  0x44   :  { %1330 = dma.done.wait [#allocation4], 192  }
  0x45   :  { %1331 = vsyncadd [#allocation4], 4294967104 }
  0x46   :  { %1332 = dma.done.wait [#allocation6], 8192  }
  0x47   :  { %1333 = vsyncadd [#allocation6], 4294959104 }
  0x48   :  { %1334 = dma.done.wait [#allocation9], 2048  }
  0x49   :  { %1335 = vsyncadd [#allocation9], 4294965248  ;;  %v1153_v0 = vld [vmem:[#allocation5 + $0x40] sm:$0xff]   ;;  %v1157_v4 = vld [vmem:[#allocation5 + $0x48] sm:$0xff]   ;;  %v1344_v22 = vmov 1983009808   ;;  %v90_v24 = vlaneseq }
  0x4a   :  { %v1154_v1 = vld [vmem:[#allocation5 + $0xc0] sm:$0xff]   ;;  %1054 = vmatprep.subr.bf16.mxu0 %v1153_v0  ;;  %v1158_v5 = vld [vmem:[#allocation5 + $0xc8] sm:$0xff]   ;;  %v1161_v8 = vld [vmem:[#allocation5 + $0x50] sm:$0xff]   ;;  %v88_v23 = vunpack.c.l.s4 %v1344_v22 }
  0x4b   :  { %v1155_v2 = vld [vmem:[#allocation5] sm:$0xff]   ;;  %1076 = vmatprep.subr.bf16.mxu1 %v1154_v1  ;;  %v1159_v6 = vld [vmem:[#allocation5 + $0x8] sm:$0xff]   ;;  %v1162_v9 = vld [vmem:[#allocation5 + $0xd0] sm:$0xff]   ;;  %v1436_v30 = vshrl.u32 %v90_v24, 7 }
  0x4c   :  { %v1156_v3 = vld [vmem:[#allocation5 + $0x80] sm:$0xff]   ;;  %1055 = vmatpush3.bf16.msra.mxu0 %v1155_v2  ;;  %v1160_v7 = vld [vmem:[#allocation5 + $0x88] sm:$0xff]   ;;  %v1163_v10 = vld [vmem:[#allocation5 + $0x10] sm:$0xff]   ;;  %v89_v29 = vunpack.c.0.s8 %v88_v23 }
  0x4d   :  { %1077 = vmatpush3.bf16.msra.mxu1 %v1156_v3  ;;  %1056 = vmatprep.subr.bf16.mxu0 %v1157_v4  ;;  %v1164_v11 = vld [vmem:[#allocation5 + $0x90] sm:$0xff]   ;;  %v1165_v12 = vld [vmem:[#allocation5 + $0x58] sm:$0xff]   ;;  %v1169_v16 = vld [vmem:[#allocation5 + $0x60] sm:$0xff]  }
  0x4e   :  { %1078 = vmatprep.subr.bf16.mxu1 %v1158_v5  ;;  %v1166_v13 = vld [vmem:[#allocation5 + $0xd8] sm:$0xff]   ;;  %v1170_v17 = vld [vmem:[#allocation5 + $0xe0] sm:$0xff]   ;;  %v1173_v20 = vld [vmem:[#allocation5 + $0x68] sm:$0xff]   ;;  %v92_v35 = vsub.s32 %v89_v29, %v1436_v30 }
  0x4f   :  { %v1167_v14 = vld [vmem:[#allocation5 + $0x18] sm:$0xff]   ;;  %v1171_v18 = vld [vmem:[#allocation5 + $0x20] sm:$0xff]   ;;  %v1174_v21 = vld [vmem:[#allocation5 + $0xe8] sm:$0xff]  }
  0x50   :  { %1057 = vmatpush3.bf16.msra.mxu0 %v1159_v6  ;;  %v1168_v15 = vld [vmem:[#allocation5 + $0x98] sm:$0xff]   ;;  %v1172_v19 = vld [vmem:[#allocation5 + $0xa0] sm:$0xff]   ;;  %v1175_v25 = vld [vmem:[#allocation5 + $0x28] sm:$0xff]  }
  0x51   :  { %1079 = vmatpush3.bf16.msra.mxu1 %v1160_v7  ;;  %1058 = vmatprep.subr.bf16.mxu0 %v1161_v8  ;;  %v1176_v26 = vld [vmem:[#allocation5 + $0xa8] sm:$0xff]   ;;  %v1177_v27 = vld [vmem:[#allocation5 + $0x70] sm:$0xff]   ;;  %v1181_v33 = vld [vmem:[#allocation5 + $0x78] sm:$0xff]  }
  0x52   :  { %1080 = vmatprep.subr.bf16.mxu1 %v1162_v9  ;;  %v1178_v28 = vld [vmem:[#allocation5 + $0xf0] sm:$0xff]   ;;  %v1182_v34 = vld [vmem:[#allocation5 + $0xf8] sm:$0xff]   ;;  %v1186_v41 = vld [vmem:[#allocation5 + $0x140] sm:$0xff]  }
  0x53   :  { %v1179_v31 = vld [vmem:[#allocation5 + $0x30] sm:$0xff]   ;;  %v1183_v36 = vld [vmem:[#allocation5 + $0x38] sm:$0xff]   ;;  %v1187_v47 = vld [vmem:[#allocation5 + $0x100] sm:$0xff]  }
  0x54   :  { %1059 = vmatpush3.bf16.msra.mxu0 %v1163_v10  ;;  %v1180_v32 = vld [vmem:[#allocation5 + $0xb0] sm:$0xff]   ;;  %v1184_v37 = vld [vmem:[#allocation5 + $0xb8] sm:$0xff]   ;;  %v1188_v49 = vld [vmem:[#allocation5 + $0x148] sm:$0xff]  }
  0x55   :  { %1081 = vmatpush3.bf16.msra.mxu1 %v1164_v11  ;;  %1060 = vmatprep.subr.bf16.mxu0 %v1165_v12  ;;  %v82_v38 = vld [vmem:[#allocation3] sm:$0xff]  ;;  %v1189_v51 = vld [vmem:[#allocation5 + $0x108] sm:$0xff]   ;;  %v1194_v56 = vld [vmem:[#allocation5 + $0x160] sm:$0xff]   ;;  %v1345_v12 = vmov 0.0  }
  0x56   :  { %1082 = vmatprep.subr.bf16.mxu1 %v1166_v13  ;;  %v93_v39 = vrot.slane %v82_v38, %v92_v35  ;;  %v86_v40 = vcombine.high %v82_v38, %v82_v38  ;;  %v1190_v52 = vld [vmem:[#allocation5 + $0x150] sm:$0xff]   ;;  %v1192_v54 = vld [vmem:[#allocation5 + $0x158] sm:$0xff]   ;;  %v1195_v59 = vld [vmem:[#allocation5 + $0x120] sm:$0xff]   ;;  %81 = vst [vmem:[#allocation2] sm:$0x3] %v1345_v12 }
  0x57   :  { %v1191_v53 = vld [vmem:[#allocation5 + $0x110] sm:$0xff]   ;;  %v1193_v55 = vld [vmem:[#allocation5 + $0x118] sm:$0xff]   ;;  %v1196_v61 = vld [vmem:[#allocation5 + $0x168] sm:$0xff]  }
  0x58   :  { %1061 = vmatpush3.bf16.msra.mxu0 %v1167_v14  ;;  %v101_v42 = vcombine.high %v93_v39, %v93_v39  ;;  %v100_v43 = vrot.slane %v86_v40, %v92_v35  ;;  %v117_v44 = vpack.c.bf16 %v93_v39, %v93_v39  ;;  %v972_v57 = vld.sshfl [vmem:[#allocation3 + $0x8] sm:$0x33 pattern:$0x76325410]  ;;  %v1197_v62 = vld [vmem:[#allocation5 + $0x128] sm:$0xff]   ;;  %v1198_v63 = vld [vmem:[#allocation5 + $0x170] sm:$0xff]  }
  0x59   :  { %1083 = vmatpush3.bf16.msra.mxu1 %v1168_v15  ;;  %1062 = vmatprep.subr.bf16.mxu0 %v1169_v16  ;;  %v110_v58 = vcombine.high %v972_v57, %v972_v57  ;;  %v1199_v0 = vld [vmem:[#allocation5 + $0x130] sm:$0xff]   ;;  %v1200_v1 = vld [vmem:[#allocation5 + $0x178] sm:$0xff]   ;;  %v121_v3 = vpack.c.bf16 %v972_v57, %v972_v57  ;;  %v1202_v4 = vld [vmem:[#allocation7] ss:$8 sps:$4 sm:$0xff]  }
  0x5a   :  { %1084 = vmatprep.subr.bf16.mxu1 %v1170_v17  ;;  %v118_v45 = vpack.c.bf16 %v101_v42, %v101_v42  ;;  %v102_v46 = vcombine.high %v100_v43, %v100_v43  ;;  %v119_v48 = vpack.c.bf16 %v100_v43, %v100_v43  ;;  %v1201_v2 = vld [vmem:[#allocation5 + $0x138] sm:$0xff]   ;;  %v1204_v5 = vld [vmem:[#allocation7 + $0x4] ss:$8 sps:$4 sm:$0xff]   ;;  %v1208_v9 = vld [vmem:[#allocation7 + $0x20] ss:$8 sps:$4 sm:$0xff]  }
  0x5b   :  { %v122_v60 = vpack.c.bf16 %v110_v58, %v110_v58  ;;  %v1207_v6 = vld [vmem:[#allocation7 + $0x14] ss:$8 sps:$4 sm:$0xff]   ;;  %v1205_v7 = vld [vmem:[#allocation7 + $0x10] ss:$8 sps:$4 sm:$0xff]   ;;  %v1210_v8 = vld [vmem:[#allocation7 + $0x24] ss:$8 sps:$4 sm:$0xff]  }
  0x5c   :  { %1063 = vmatpush3.bf16.msra.mxu0 %v1171_v18  ;;  %540 = vmatprep.mubr.bf16.mxu0 %v118_v45  ;;  %v120_v50 = vpack.c.bf16 %v102_v46, %v102_v46  ;;  %v1213_v10 = vld [vmem:[#allocation7 + $0x34] ss:$8 sps:$4 sm:$0xff]   ;;  %v1211_v11 = vld [vmem:[#allocation7 + $0x30] ss:$8 sps:$4 sm:$0xff]   ;;  %v1216_v13 = vld [vmem:[#allocation7 + $0x44] ss:$8 sps:$4 sm:$0xff]  }
  0x5d   :  { %1085 = vmatpush3.bf16.msra.mxu1 %v1172_v19  ;;  %1064 = vmatprep.subr.bf16.mxu0 %v1173_v20  ;;  %v1214_v14 = vld [vmem:[#allocation7 + $0x40] ss:$8 sps:$4 sm:$0xff]   ;;  %v1219_v15 = vld [vmem:[#allocation7 + $0x54] ss:$8 sps:$4 sm:$0xff]   ;;  %v1217_v16 = vld [vmem:[#allocation7 + $0x50] ss:$8 sps:$4 sm:$0xff]  }
  0x5e   :  { %1086 = vmatprep.subr.bf16.mxu1 %v1174_v21  ;;  %580 = vmatprep.mubr.bf16.mxu1 %v120_v50  ;;  %v1222_v17 = vld [vmem:[#allocation7 + $0x64] ss:$8 sps:$4 sm:$0xff]   ;;  %v1220_v18 = vld [vmem:[#allocation7 + $0x60] ss:$8 sps:$4 sm:$0xff]   ;;  %v1225_v19 = vld [vmem:[#allocation7 + $0x74] ss:$8 sps:$4 sm:$0xff]  }
  0x5f   :  { %v1346_v20 = vmov 0   ;;  %v1223_v21 = vld [vmem:[#allocation7 + $0x70] ss:$8 sps:$4 sm:$0xff]   ;;  %v1226_v22 = vld [vmem:[#allocation8 + $0x40] sm:$0xff]   ;;  %v1228_v24 = vld [vmem:[#allocation8 + $0x48] sm:$0xff]  }
  0x60   :  { %1065 = vmatpush3.bf16.msra.mxu0 %v1175_v25  ;;  %v1227_v23 = vld [vmem:[#allocation8] sm:$0xff]   ;;  %v1229_v25 = vld [vmem:[#allocation8 + $0x8] sm:$0xff]   ;;  %v1233_v29 = vld [vmem:[#allocation8 + $0x18] sm:$0xff]  }
  0x61   :  { %1087 = vmatpush3.bf16.msra.mxu1 %v1176_v26  ;;  %1066 = vmatprep.subr.bf16.mxu0 %v1177_v27  ;;  %v1230_v26 = vld [vmem:[#allocation8 + $0x50] sm:$0xff]   ;;  %v1240_v58 = vld [vmem:[#allocation8 + $0x78] sm:$0xff]  }
  0x62   :  { %1088 = vmatprep.subr.bf16.mxu1 %v1178_v28  ;;  %v1231_v27 = vld [vmem:[#allocation8 + $0x10] sm:$0xff]   ;;  %v1232_v28 = vld [vmem:[#allocation8 + $0x58] sm:$0xff]  }
  0x63   :  { %v123_v50 = vld [vmem:[#allocation2] sm:$0x3] }
  0x64   :  { %1067 = vmatpush3.bf16.msra.mxu0 %v1179_v31  ;;  %v1234_v31 = vld [vmem:[#allocation8 + $0x60] sm:$0xff]   ;;  %v1239_v57 = vld [vmem:[#allocation8 + $0x30] sm:$0xff]  }
  0x65   :  { %1089 = vmatpush3.bf16.msra.mxu1 %v1180_v32  ;;  %1068 = vmatprep.subr.bf16.mxu0 %v1181_v33  ;;  %v1235_v32 = vld [vmem:[#allocation8 + $0x20] sm:$0xff]   ;;  %v1236_v33 = vld [vmem:[#allocation8 + $0x68] sm:$0xff]   ;;  %v1037_v12 = vld [vmem:[%s1455_s5] ss:$0 sm:$0xff] }
  0x66   :  { %1090 = vmatprep.subr.bf16.mxu1 %v1182_v34  ;;  %v1237_v34 = vld [vmem:[#allocation8 + $0x28] sm:$0xff]  }
  0x68   :  { %1069 = vmatpush3.bf16.msra.mxu0 %v1183_v36 }
  0x69   :  { %1091 = vmatpush3.bf16.msra.mxu1 %v1184_v37  ;;  %1098 = vmatprep.subr.bf16.mxu0 %v1186_v41 }
  0x6a   :  { %743 = vmatprep.subr.bf16.mxu1 %v1204_v5 }
  0x6b   :  { %541 = vmatmul.mubr.bf16.vlgmr.msra.gmra.mrb[0].mxu0 %v117_v44 }
  0x6c   :  { %1099 = vmatpush3.bf16.msra.mxu0 %v1187_v47  ;;  %581 = vmatmul.mubr.bf16.vlgmr.msra.gmra.mrb[0].mxu1 %v119_v48 }
  0x6d   :  { %1100 = vmatprep.subr.bf16.mxu0 %v1188_v49  ;;  %620 = vmatprep.mubr.bf16.mxu0 %v122_v60  ;;  %v655_v60 = vsub.s32 0, %v1436_v30 }
  0x6e   :  { %744 = vmatpush1.bf16.msra.mxu1 %v1202_v4  ;;  %775 = vmatprep.mubr.bf16.mxu1 %v1346_v20 }
  0x6f   :  { %745 = vmatprep.subr.bf16.mxu1 %v1207_v6 }
  0x70   :  { %1101 = vmatpush3.bf16.msra.mxu0 %v1189_v51 }
  0x71   :  { %1102 = vmatprep.subr.bf16.mxu0 %v1190_v52 }
  0x72   :  { %746 = vmatpush1.bf16.msra.mxu1 %v1205_v7 }
  0x73   :  { %747 = vmatprep.subr.bf16.mxu1 %v1210_v8 }
  0x74   :  { %1103 = vmatpush3.bf16.msra.mxu0 %v1191_v53 }
  0x75   :  { %1104 = vmatprep.subr.bf16.mxu0 %v1192_v54 }
  0x76   :  { %748 = vmatpush1.bf16.msra.mxu1 %v1208_v9 }
  0x77   :  { %749 = vmatprep.subr.bf16.mxu1 %v1213_v10 }
  0x78   :  { %1105 = vmatpush3.bf16.msra.mxu0 %v1193_v55 }
  0x79   :  { %1106 = vmatprep.subr.bf16.mxu0 %v1194_v56  ;;  %v1238_v56 = vld [vmem:[#allocation8 + $0x70] sm:$0xff]  }
  0x7a   :  { %750 = vmatpush1.bf16.msra.mxu1 %v1211_v11 }
  0x7b   :  { %751 = vmatprep.subr.bf16.mxu1 %v1216_v13 }
  0x7c   :  { %1107 = vmatpush3.bf16.msra.mxu0 %v1195_v59  ;;  %v1241_v59 = vld [vmem:[#allocation8 + $0x38] sm:$0xff]  }
  0x7d   :  { %1108 = vmatprep.subr.bf16.mxu0 %v1196_v61  ;;  %v651_v61 = vld [vmem:[%s1453_s3] sm:$0x3] }
  0x7e   :  { %752 = vmatpush1.bf16.msra.mxu1 %v1214_v14 }
  0x7f   :  { %753 = vmatprep.subr.bf16.mxu1 %v1219_v15 }
  0x80   :  { %1109 = vmatpush3.bf16.msra.mxu0 %v1197_v62  ;;  %v659_v62 = vsub.s32 1, %v1436_v30 }
  0x81   :  { %1110 = vmatprep.subr.bf16.mxu0 %v1198_v63  ;;  %v656_v63 = vrot.slane %v651_v61, %v655_v60 }
  0x82   :  { %754 = vmatpush1.bf16.msra.mxu1 %v1217_v16 }
  0x83   :  { %755 = vmatprep.subr.bf16.mxu1 %v1222_v17 }
  0x84   :  { %1111 = vmatpush3.bf16.msra.mxu0 %v1199_v0  ;;  %v660_v0 = vrot.slane %v651_v61, %v659_v62 }
  0x85   :  { %1112 = vmatprep.subr.bf16.mxu0 %v1200_v1 }
  0x86   :  { %756 = vmatpush1.bf16.msra.mxu1 %v1220_v18 }
  0x87   :  { %757 = vmatprep.subr.bf16.mxu1 %v1225_v19 }
  0x88   :  { %1113 = vmatpush3.bf16.msra.mxu0 %v1201_v2 }
  0x89   :  { %1120 = vmatprep.subr.bf16.mxu0 %v1226_v22 }
  0x8a   :  { %758 = vmatpush1.bf16.msra.mxu1 %v1223_v21 }
  0x8b   :  { %621 = vmatmul.mubr.bf16.vlgmr.msra.gmra.mrb[4].mxu0 %v121_v3 }
  0x8c   :  { %1121 = vmatpush3.bf16.msra.mxu0 %v1227_v23 }
  0x8d   :  { %1122 = vmatprep.subr.bf16.mxu0 %v1228_v24 }
  0x90   :  { %1123 = vmatpush3.bf16.msra.mxu0 %v1229_v25 }
  0x91   :  { %1124 = vmatprep.subr.bf16.mxu0 %v1230_v26 }
  0x94   :  { %1125 = vmatpush3.bf16.msra.mxu0 %v1231_v27 }
  0x95   :  { %1126 = vmatprep.subr.bf16.mxu0 %v1232_v28 }
  0x98   :  { %1127 = vmatpush3.bf16.msra.mxu0 %v1233_v29 }
  0x99   :  { %1128 = vmatprep.subr.bf16.mxu0 %v1234_v31 }
  0x9c   :  { %1129 = vmatpush3.bf16.msra.mxu0 %v1235_v32 }
  0x9d   :  { %1130 = vmatprep.subr.bf16.mxu0 %v1236_v33 }
  0xa0   :  { %1131 = vmatpush3.bf16.msra.mxu0 %v1237_v34 }
  0xa1   :  { %1132 = vmatprep.subr.bf16.mxu0 %v1238_v56 }
  0xa4   :  { %1133 = vmatpush3.bf16.msra.mxu0 %v1239_v57 }
  0xa5   :  { %1134 = vmatprep.subr.bf16.mxu0 %v1240_v58 }
  0xa8   :  { %1135 = vmatpush3.bf16.msra.mxu0 %v1241_v59 }
 0x13e   :  { %v1070_v35 = vpop.f32.mrb[0].mxu0 }
 0x13f   :  { %v1071_v36 = vpop.f32.mrb[1].mxu0  ;;  %v1092_v37 = vpop.f32.mrb[0].mxu1 }
 0x140   :  { %v1072_v38 = vadd.f32 %v1071_v36, %v1070_v35  ;;  %v1073_v39 = vpop.f32.mrb[2].mxu0  ;;  %v1093_v40 = vpop.f32.mrb[1].mxu1 }
 0x141   :  { %v1074_v41 = vpop.f32.mrb[3].mxu0  ;;  %v1094_v42 = vadd.f32 %v1093_v40, %v1092_v37  ;;  %v1095_v43 = vpop.f32.mrb[2].mxu1 }
 0x142   :  { %v1096_v44 = vpop.f32.mrb[3].mxu1 }
 0x143   :  { %v583_v45 = vadd.f32 %v1094_v42, %v1072_v38 }
 0x15e   :  { %v1114_v46 = vpop.f32.mrb[4].mxu0 }
 0x15f   :  { %v1115_v47 = vpop.f32.mrb[5].mxu0 }
 0x160   :  { %v1116_v48 = vadd.f32 %v1115_v47, %v1114_v46  ;;  %v1117_v49 = vpop.f32.mrb[6].mxu0 }
 0x161   :  { %v1118_v51 = vpop.f32.mrb[7].mxu0 }
 0x162   :  { %v623_v52 = vadd.f32 %v1116_v48, %v583_v45 }
 0x164   :  { %v628_v53 = vadd.f32 %v623_v52, %v123_v50 }
 0x166   :  { %629 = vst [vmem:[#allocation2] sm:$0x3] %v628_v53 }
 0x16d   :  { %v633_v54 = vld [vmem:[#allocation2] sm:$0x3] }
 0x16e   :  { %v634_v55 = vpack.c.bf16 %v633_v54, %v633_v54 }
 0x170   :  { %776 = vmatmul.mubr.bf16.vlgmr.msra.gmra.mrb[4].mxu1 %v634_v55 }
 0x243   :  { %v777_v1 = vpop.f32.mrb[4].mxu1 }
 0x244   :  { %v778_v2 = vadd.f32 %v777_v1, %v656_v63  ;;  %v779_v3 = vpop.f32.mrb[5].mxu1 }
 0x245   :  { %v780_v4 = vadd.f32 %v779_v3, %v660_v0  ;;  %v781_v5 = vpop.f32.mrb[6].mxu1 }
 0x246   :  { %v784_v6 = vmax.f32 %v778_v2, 0.0  ;;  %v782_v7 = vpop.f32.mrb[7].mxu1 }
 0x247   :  { %v785_v8 = vmax.f32 %v780_v4, 0.0 }
 0x248   :  { %v786_v10 = vpack.c.bf16 %v784_v6, %v784_v6 }
 0x249   :  { %v787_v9 = vpack.c.bf16 %v785_v8, %v785_v8 }
 0x24b   :  { %955 = vmatprep.mubr.bf16.mxu0 %v787_v9 }
 0x24c   :  { %956 = vmatmul.mubr.bf16.vlgmr.msra.gmra.mrb[8].mxu0 %v786_v10 }
 0x31f   :  { %v1136_v11 = vpop.f32.mrb[8].mxu0 }
 0x320   :  { %v1137_v30 = vpop.f32.mrb[9].mxu0 }
 0x321   :  { %v1138_v13 = vadd.f32 %v1137_v30, %v1136_v11  ;;  %v1139_v14 = vpop.f32.mrb[10].mxu0 }
 0x322   :  { %v1140_v15 = vpop.f32.mrb[11].mxu0 }
 0x323   :  { %v958_v16 = vadd.f32 %v1138_v13, %v1037_v12 }
 0x325   :  { %v963_v17 = vpack.c.bf16 %v958_v16, %v958_v16 }
 0x327   :  { %964 = vst [vmem:[%s1456_s6] sm:$0x1] %v963_v17 }
 0x328   :  { %969 = vsyncpa [#allocation4], 1 }
 0x329   :  { %970 = vsyncpa [#allocation6], 1 }
 0x32a   :  { %971 = vsyncpa [#allocation9], 1 }

</bundles_post_ra>
